<compile_context>
chip_gen: v7x
topology: tpu7x:2x2x1
jax: 0.10.0
libtpu: 0.0.40
codegen_flags: <defaults>
</compile_context>

<pallas_src>
import jax
import jax.numpy as jnp
import numpy as np
from jax.experimental import pallas as pl
from jax.experimental.pallas import tpu as pltpu

_LANE = 128      # vreg lane width
_SUBLANE = 8     # vreg sublane count (f32)
_MAX_TM = 512    # M-tile size if the batch ever gets large


def _round_up(x, m):
    return (x + m - 1) // m * m


# ----------------------------------------------------------------------------
# Pallas kernel: one MXU matmul + VPU bias add per M-tile.
# ----------------------------------------------------------------------------
def linear_kernel(x_ref, w_ref, b_ref, o_ref):
    # x: [tm, K], w: [K, Np], b: [1, Np]  ->  o: [tm, Np]
    o_ref[...] = (
        jnp.dot(x_ref[...], w_ref[...], preferred_element_type=jnp.float32)
        + b_ref[...]
    )


# ----------------------------------------------------------------------------
# Wrapper: pad to lane/sublane-dense shapes, single fused pallas_call, slice.
# ----------------------------------------------------------------------------
def linear_regression_forward(x, weight, bias):
    """nn.Linear forward: y = x @ weight.T + bias (weight is [out, in])."""
    x = jnp.asarray(x, jnp.float32)
    weight = jnp.asarray(weight, jnp.float32)
    bias = jnp.asarray(bias, jnp.float32)

    *lead, K = x.shape
    N = weight.shape[0]
    M = int(np.prod(lead)) if lead else 1
    x2d = x.reshape(M, K)

    # Lane/sublane-dense padding (zeros): M -> mult of 8, N -> mult of 128.
    Mp = _round_up(max(M, 1), _SUBLANE)
    Np = _round_up(max(N, 1), _LANE)
    tm = min(Mp, _MAX_TM)
    Mp = _round_up(Mp, tm)                      # make grid divide evenly

    x_p = jnp.zeros((Mp, K), jnp.float32).at[:M, :].set(x2d)
    w_p = jnp.zeros((K, Np), jnp.float32).at[:, :N].set(weight.T)
    b_p = jnp.zeros((1, Np), jnp.float32).at[:, :N].set(bias[None, :])

    out_p = pl.pallas_call(
        linear_kernel,
        out_shape=jax.ShapeDtypeStruct((Mp, Np), jnp.float32),
        grid=(Mp // tm,),
        in_specs=[
            pl.BlockSpec((tm, K), lambda i: (i, 0)),   # x tile
            pl.BlockSpec((K, Np), lambda i: (0, 0)),   # full weight, resident
            pl.BlockSpec((1, Np), lambda i: (0, 0)),   # bias row, resident
        ],
        out_specs=pl.BlockSpec((tm, Np), lambda i: (i, 0)),
        compiler_params=pltpu.CompilerParams(
            dimension_semantics=("parallel",)),        # 2 TCs on v7x
    )(x_p, w_p, b_p)

    out = out_p[:M, :N]
    return out.reshape(*lead, N) if lead else out.reshape(N)


# ----------------------------------------------------------------------------
# pure-JAX reference
# ----------------------------------------------------------------------------
def ref_forward(x, weight, bias):
    return jnp.asarray(x, jnp.float32) @ weight.T + bias


# ----------------------------------------------------------------------------
if __name__ == "__main__":
    batch, input_size, output_size = 2, 32, 5

    key = jax.random.PRNGKey(0)
    kx, kw, kb = jax.random.split(key, 3)

    # Deterministic "nn.Linear"-style params (PyTorch [out, in] layout).
    bound = 1.0 / np.sqrt(input_size)
    weight = jax.random.uniform(kw, (output_size, input_size),
                                minval=-bound, maxval=bound,
                                dtype=jnp.float32)
    bias = jax.random.uniform(kb, (output_size,),
                              minval=-bound, maxval=bound,
                              dtype=jnp.float32)
    x = jax.random.normal(kx, (batch, input_size), dtype=jnp.float32)

    fwd = jax.jit(linear_regression_forward)
    out = jax.block_until_ready(fwd(x, weight, bias))

    ref = ref_forward(x, weight, bias)
    np.testing.assert_allclose(np.asarray(out), np.asarray(ref),
                               rtol=1e-5, atol=1e-5)

    print("KERNEL_OK")
</pallas_src>

<mosaic_0001>
module attributes {stable_mosaic.version = 11 : i64} {
  func.func @linear_kernel(%arg0: i32, %arg1: memref<8x32xf32, #tpu.memory_space<vmem>>, %arg2: memref<32x128xf32, #tpu.memory_space<vmem>>, %arg3: memref<1x128xf32, #tpu.memory_space<vmem>>, %arg4: memref<8x128xf32, #tpu.memory_space<vmem>>) attributes {dimension_semantics = [#tpu.dimension_semantics<parallel>], iteration_bounds = array<i64: 1>, scalar_prefetch = 0 : i64, scratch_operands = 0 : i64, tpu.core_type = #tpu.core_type<tc>, window_params = [{transform_indices = @transform_0, window_bounds = array<i64: 8, 32>}, {pipeline_mode = #tpu.pipeline_mode<synchronous>, transform_indices = @transform_1, window_bounds = array<i64: 32, 128>}, {pipeline_mode = #tpu.pipeline_mode<synchronous>, transform_indices = @transform_2, window_bounds = array<i64: 1, 128>}, {transform_indices = @transform_3, window_bounds = array<i64: 8, 128>}]} {
    %c0 = arith.constant 0 : index
    %c0_0 = arith.constant 0 : index
    %0 = vector.load %arg1[%c0, %c0_0] : memref<8x32xf32, #tpu.memory_space<vmem>>, vector<8x32xf32>
    %c0_1 = arith.constant 0 : index
    %c0_2 = arith.constant 0 : index
    %1 = vector.load %arg2[%c0_1, %c0_2] : memref<32x128xf32, #tpu.memory_space<vmem>>, vector<32x128xf32>
    %cst = arith.constant dense<0.000000e+00> : vector<8x128xf32>
    %2 = tpu.matmul %0, %1, %cst {dimension_numbers = #tpu.dot_dimension_numbers<[1], [0], [0], [1], [0, 0, 1, 1], [], []>} : vector<8x32xf32>, vector<32x128xf32>, vector<8x128xf32> -> vector<8x128xf32>
    %c0_3 = arith.constant 0 : index
    %c0_4 = arith.constant 0 : index
    %3 = vector.load %arg3[%c0_3, %c0_4] : memref<1x128xf32, #tpu.memory_space<vmem>>, vector<1x128xf32>
    %4 = vector.broadcast %3 : vector<1x128xf32> to vector<8x128xf32>
    %5 = arith.addf %2, %4 : vector<8x128xf32>
    %c0_5 = arith.constant 0 : index
    %c0_6 = arith.constant 0 : index
    %6 = vector.load %arg4[%c0_5, %c0_6] : memref<8x128xf32, #tpu.memory_space<vmem>>, vector<8x128xf32>
    tpu.vector_store %arg4[%c0_5, %c0_6], %5 {strides = array<i32>} : memref<8x128xf32, #tpu.memory_space<vmem>>, vector<8x128xf32>,
    return
  }
  func.func @transform_0(%arg0: i32) -> (i32, i32) {
    %c0_i32 = arith.constant 0 : i32
    %c0_i32_0 = arith.constant 0 : i32
    return %arg0, %c0_i32 : i32, i32
  }
  func.func @transform_1(%arg0: i32) -> (i32, i32) {
    %c0_i32 = arith.constant 0 : i32
    %c0_i32_0 = arith.constant 0 : i32
    %c0_i32_1 = arith.constant 0 : i32
    return %c0_i32, %c0_i32_0 : i32, i32
  }
  func.func @transform_2(%arg0: i32) -> (i32, i32) {
    %c0_i32 = arith.constant 0 : i32
    %c0_i32_0 = arith.constant 0 : i32
    %c0_i32_1 = arith.constant 0 : i32
    return %c0_i32, %c0_i32_0 : i32, i32
  }
  func.func @transform_3(%arg0: i32) -> (i32, i32) {
    %c0_i32 = arith.constant 0 : i32
    %c0_i32_0 = arith.constant 0 : i32
    return %arg0, %c0_i32 : i32, i32
  }
}

</mosaic_0001>

<bundles_post_ra>
// kernel: linear_regression_forward.1
= control target key start
LH: loop header
LB: loop body
LE: loop exit
PB: predicated region body
PF: predicated region fallthrough
CT: control target
= control target key end

     0   :  { %v132_v0 = vmov 0.0|0.0   ;;  %vm133_vm0 = vmmov 0   ;;  %v134_v4 = vmov 0.0   ;;  %vm26_vm1 = vcmask 261120   ;;  %s176_s1 = inlined_call_operand.vmem [shape: f32[32,128], index: 1, kind: input, shape index: {}]   ;;  %s177_s0 = inlined_call_operand.vmem [shape: f32[8,32], index: 0, kind: input, shape index: {}]   ;;  %s178_s2 = inlined_call_operand.vmem [shape: f32[1,128], index: 2, kind: input, shape index: {}]   ;;  %s179_s3 = inlined_call_operand.vmem [shape: f32[8,128], index: 3, kind: output, shape index: {}]  }
   0x1   :  { %123 = vmatprep.subr.bf16.mxu0 %v132_v0  ;;  %v15_v1 = vld [vmem:[%s176_s1] sm:$0xff]  ;;  %v16_v2 = vld [vmem:[%s176_s1 + $0x8] sm:$0xff]  ;;  %v17_v3 = vld [vmem:[%s176_s1 + $0x10] sm:$0xff]  ;;  %120 = vmatprep.mubr.msk.f32.mxu0 %vm133_vm0, %v134_v4 }
   0x2   :  { %v124_v5 = vpack.c.bf16 %v16_v2, %v15_v1  ;;  %v18_v6 = vld [vmem:[%s176_s1 + $0x18] sm:$0xff]  ;;  %v14_v8 = vld [vmem:[%s177_s0] sm:$0xff] }
   0x3   :  { %v127_v7 = vpack.c.bf16 %v18_v6, %v17_v3  ;;  %v105_v9 = vld [vmem:[%s178_s2] ss:$0 sm:$0xff] }
   0x4   :  { %125 = vmatpush3.bf16.msra.mxu0 %v124_v5 }
   0x5   :  { %126 = vmatprep.subr.bf16.mxu0 %v132_v0 }
   0x8   :  { %128 = vmatpush3.bf16.msra.mxu0 %v127_v7 }
   0xb   :  { %121 = vmatmul.mubr.msk.f32.vlgmr.msra.gmra.mrb[0].mxu0 %vm26_vm1, %v14_v8 }
  0xde   :  { %v96_v10 = vpop.f32.mrb[0].mxu0 }
  0xdf   :  { %v97_v11 = vadd.f32 %v105_v9, %v96_v10  ;;  %v122_v12 = vpop.f32.mrb[1].mxu0 }
  0xe1   :  { %100 = vst [vmem:[%s179_s3] sm:$0xff] %v97_v11 }

</bundles_post_ra>
